<compile_context>
chip_gen: v7x
topology: tpu7x:2x2x1
jax: 0.10.0
libtpu: 0.0.40
codegen_flags: <defaults>
</compile_context>

<pallas_src>
import functools

import jax
import jax.numpy as jnp
from jax import lax
from jax.experimental import pallas as pl
from jax.experimental.pallas import tpu as pltpu

_LANES = 128
_VMEM_BUDGET = 40 * 1024 * 1024   # tile-sizing budget: 2x input blocks + f32 temps
_VMEM_LIMIT = 48 * 1024 * 1024    # scoped-VMEM limit (v7x: 64 MiB physical)


def _accumulate(s, tgt, valid, inter_acc, z_acc, y_acc, *, apply_softmax):
    """Fold one (C, rows, 128) tile into the lane-dense (C, 128) accumulators."""
    c = s.shape[0]
    if valid is not None:
        # Select (not multiply): must kill NaN/Inf garbage in OOB sublanes.
        s = jnp.where(valid, s, 0.0)
    if apply_softmax:
        m = jnp.max(s, axis=0, keepdims=True)
        e = jnp.exp(s - m)
        denom = jnp.sum(e, axis=0, keepdims=True)
        s = e * pl.reciprocal(denom, approx=True)        # EUP slot, ~2^-12 rel err
        if valid is not None:
            s = jnp.where(valid, s, 0.0)                 # padded cols contribute 0

    tgt0 = tgt[0]                                        # (rows, 128), native dtype
    v0 = None if valid is None else valid[0]
    inter_rows, z_rows, y_rows = [], [], []
    for i in range(c):                                   # small C: avoids 3-D iota
        si = s[i]                                        # (rows, 128)
        match = tgt0 == jnp.asarray(i, tgt0.dtype)       # PyTorch: input == i*ones
        if v0 is not None:
            match = jnp.logical_and(match, v0)
        oh = match.astype(jnp.float32)
        inter_rows.append(jnp.sum(si * oh, axis=0, keepdims=True))
        z_rows.append(jnp.sum(si * si, axis=0, keepdims=True))
        y_rows.append(jnp.sum(oh, axis=0, keepdims=True))       # oh*oh == oh
    inter_acc[...] += jnp.concatenate(inter_rows, axis=0)       # (C, 128)
    z_acc[...] += jnp.concatenate(z_rows, axis=0)
    y_acc[...] += jnp.concatenate(y_rows, axis=0)


def _dice_tiles_kernel(score_ref, target_ref, inter_ref, z_ref, y_ref,
                       inter_acc, z_acc, y_acc, *,
                       apply_softmax, hw, tiles_per_split, needs_tail_mask):
    """Per-(batch, split, tile) reduction step.

    score_ref : (C, rows, 128)  predictions (logits if apply_softmax else probs)
    target_ref: (1, rows, 128)  labels (native dtype)
    *_ref     : (C, 128) f32    lane-dense per-(batch,split) partial sums
    *_acc     : (C, 128) f32    VMEM accumulators (persist across the tile axis)
    """
    t = pl.program_id(2)
    n_t = pl.num_programs(2)

    @pl.when(t == 0)
    def _():
        inter_acc[...] = jnp.zeros_like(inter_acc)
        z_acc[...] = jnp.zeros_like(z_acc)
        y_acc[...] = jnp.zeros_like(y_acc)

    c, rows, lanes = score_ref.shape
    s = score_ref[...].astype(jnp.float32)
    tgt = target_ref[...]

    if not needs_tail_mask:
        # Spatial size divides the tiling: no mask code anywhere.
        _accumulate(s, tgt, None, inter_acc, z_acc, y_acc,
                    apply_softmax=apply_softmax)
    else:
        gt = pl.program_id(1) * tiles_per_split + t      # global tile index
        tile_start = gt * (rows * lanes)
        is_tail = tile_start + rows * lanes > hw

        @pl.when(jnp.logical_not(is_tail))               # unmasked fast path
        def _():
            _accumulate(s, tgt, None, inter_acc, z_acc, y_acc,
                        apply_softmax=apply_softmax)

        @pl.when(is_tail)                                # masked boundary tile
        def _():
            row_ids = lax.broadcasted_iota(jnp.int32, (1, rows, lanes), 1)
            lane_ids = lax.broadcasted_iota(jnp.int32, (1, rows, lanes), 2)
            valid = (tile_start + row_ids * lanes + lane_ids) < hw
            _accumulate(s, tgt, valid, inter_acc, z_acc, y_acc,
                        apply_softmax=apply_softmax)

    @pl.when(t == n_t - 1)
    def _():
        inter_ref[...] = inter_acc[...]
        z_ref[...] = z_acc[...]
        y_ref[...] = y_acc[...]


def _dice_full_kernel(score_ref, target_ref, inter_ref, z_ref, y_ref, *,
                      apply_softmax):
    """Un-aligned spatial sizes: one full (C, HW) block per batch element."""
    c, _ = score_ref.shape
    s = score_ref[...].astype(jnp.float32)               # (C, HW)
    if apply_softmax:
        m = jnp.max(s, axis=0, keepdims=True)
        e = jnp.exp(s - m)
        s = e * pl.reciprocal(jnp.sum(e, axis=0, keepdims=True), approx=True)
    tgt = target_ref[...]                                # (1, HW), native dtype
    inter_rows, z_rows, y_rows = [], [], []
    for i in range(c):
        si = s[i:i + 1]                                  # (1, HW)
        oh = (tgt == jnp.asarray(i, tgt.dtype)).astype(jnp.float32)
        inter_rows.append(jnp.sum(si * oh, axis=1, keepdims=True))
        z_rows.append(jnp.sum(si * si, axis=1, keepdims=True))
        y_rows.append(jnp.sum(oh, axis=1, keepdims=True))
    inter_ref[...] = jnp.concatenate(inter_rows, axis=0)        # (C, 1)
    z_ref[...] = jnp.concatenate(z_rows, axis=0)
    y_ref[...] = jnp.concatenate(y_rows, axis=0)


def _dice_sums_full(score, tgt, apply_softmax):
    B, C, HW = score.shape
    kernel = functools.partial(_dice_full_kernel, apply_softmax=apply_softmax)
    out_sd = jax.ShapeDtypeStruct((B, C, 1), jnp.float32)
    out_map = lambda b: (b, 0, 0)
    return pl.pallas_call(
        kernel,
        out_shape=(out_sd, out_sd, out_sd),
        grid=(B,),
        in_specs=[
            pl.BlockSpec((pl.Squeezed(), C, HW), lambda b: (b, 0, 0)),
            pl.BlockSpec((pl.Squeezed(), 1, HW), lambda b: (b, 0, 0)),
        ],
        out_specs=tuple(pl.BlockSpec((pl.Squeezed(), C, 1), out_map)
                        for _ in range(3)),
        compiler_params=pltpu.CompilerParams(
            dimension_semantics=("parallel",),
            vmem_limit_bytes=_VMEM_LIMIT),
    )(score, tgt)


def _combine(intersect, z_sum, y_sum, n_classes, weight):
    smooth = 1e-05
    dice = 1.0 - (2.0 * intersect + smooth) / (z_sum + y_sum + smooth)
    if weight is None:
        w = jnp.ones((n_classes,), jnp.float32)
    else:
        w = jnp.asarray(weight, jnp.float32)
    # TODO(synk): class_wise_dice (per-class .item() logging in the PyTorch
    # module) is host-side bookkeeping and is not part of the returned loss.
    return jnp.sum(dice * w) / n_classes


def dice_loss(inputs, target, n_classes, weight=None, softmax=False):
    """Pallas implementation of DiceLoss.forward.

    inputs : [B, C, H, W] float (probabilities, or logits if softmax=True)
    target : [B, 1, H, W] (or [B, H, W]) label map with class indices in [0, C)
    """
    inputs = jnp.asarray(inputs)
    target = jnp.asarray(target)
    B, C, H, W = inputs.shape
    assert C == n_classes, "predict & target shape do not match"
    HW = H * W

    # Sub-32-bit label dtypes would need 32-row sublane tiling; widen (exact).
    if jnp.dtype(target.dtype).itemsize < 4:
        target = (target.astype(jnp.int32)
                  if jnp.issubdtype(target.dtype, jnp.integer)
                  else target.astype(jnp.float32))

    score_item = jnp.dtype(inputs.dtype).itemsize
    tgt_item = jnp.dtype(target.dtype).itemsize

    score = inputs.reshape(B, C, HW)          # free reshape, no transpose
    tgt = target.reshape(B, 1, HW)            # native dtype, no astype pass

    if HW % _LANES != 0:
        # Un-aligned spatial size (rare): consume the un-padded [B, C, HW]
        # layout with one full-spatial block per batch -- no copy of scores.
        full_bytes = 2 * (C * HW * score_item + HW * tgt_item) + 6 * C * HW * 4
        if full_bytes <= _VMEM_BUDGET:
            inter, z, y = _dice_sums_full(score, tgt, softmax)
            return _combine(jnp.sum(inter, axis=(0, 2)),
                            jnp.sum(z, axis=(0, 2)),
                            jnp.sum(y, axis=(0, 2)), n_classes, weight)
        # Last resort (huge un-aligned images): minimal (<128 col) pad.
        # TODO(synk): this path materializes one extra copy of the scores.
        pad = _LANES - HW % _LANES
        score = jnp.pad(score, ((0, 0), (0, 0), (0, pad)))
        tgt = jnp.pad(tgt, ((0, 0), (0, 0), (0, pad)))

    R = score.shape[-1] // _LANES
    score = score.reshape(B, C, R, _LANES)
    tgt4 = tgt.reshape(B, 1, R, _LANES)

    # Tile sizing: count double-buffered input blocks + ~6x f32 temporaries.
    bytes_per_row = (2 * _LANES * (C * score_item + tgt_item)
                     + 6 * C * _LANES * 4)
    budget_rows = max(8, ((_VMEM_BUDGET // bytes_per_row) // 8) * 8)
    rows_tile = min(1024, budget_rows)

    n_splits = 1
    if B == 1 and R >= 16:
        # Split the spatial axis into two parallel groups (both TCs on v7x).
        rows_tile = min(rows_tile, 8 * pl.cdiv(pl.cdiv(R, 2), 8))
        n_tiles = pl.cdiv(R, rows_tile)
        if n_tiles % 2 == 1:
            alt = 8 * pl.cdiv(R, 8 * (n_tiles + 1))
            if alt >= 8 and pl.cdiv(R, alt) % 2 == 0:
                rows_tile = alt
        if pl.cdiv(R, rows_tile) % 2 == 0:
            n_splits = 2
    if n_splits == 1 and R <= rows_tile:
        rows_tile = R                         # single full-dim tile (always legal)
    n_tiles = pl.cdiv(R, rows_tile)
    assert n_tiles % n_splits == 0
    tiles_per_split = n_tiles // n_splits

    needs_tail_mask = (R % rows_tile != 0) or (R * _LANES != HW)

    kernel = functools.partial(
        _dice_tiles_kernel, apply_softmax=softmax, hw=HW,
        tiles_per_split=tiles_per_split, needs_tail_mask=needs_tail_mask)
    out_sd = jax.ShapeDtypeStruct((B * n_splits, C, _LANES), jnp.float32)
    in_map = lambda b, s, t: (b, 0, s * tiles_per_split + t, 0)
    out_map = lambda b, s, t: (b * n_splits + s, 0, 0)

    inter, z, y = pl.pallas_call(
        kernel,
        out_shape=(out_sd, out_sd, out_sd),
        grid=(B, n_splits, tiles_per_split),
        in_specs=[
            pl.BlockSpec((pl.Squeezed(), C, rows_tile, _LANES), in_map),
            pl.BlockSpec((pl.Squeezed(), 1, rows_tile, _LANES), in_map),
        ],
        out_specs=tuple(pl.BlockSpec((pl.Squeezed(), C, _LANES), out_map)
                        for _ in range(3)),
        scratch_shapes=[pltpu.VMEM((C, _LANES), jnp.float32)] * 3,
        compiler_params=pltpu.CompilerParams(
            dimension_semantics=("parallel", "parallel", "arbitrary"),
            vmem_limit_bytes=_VMEM_LIMIT),
    )(score, tgt4)

    # Tiny final reduce (lane axis + batch/split) + combine in plain JAX.
    return _combine(jnp.sum(inter, axis=(0, 2)),
                    jnp.sum(z, axis=(0, 2)),
                    jnp.sum(y, axis=(0, 2)), n_classes, weight)


def _reference_dice_loss(inputs, target, n_classes, weight=None, softmax=False):
    """Pure-JAX transcription of the PyTorch module, for verification."""
    if softmax:
        inputs = jax.nn.softmax(inputs, axis=1)
    tgt = jnp.asarray(target).astype(jnp.float32)
    onehot = jnp.concatenate(
        [(tgt == i).astype(jnp.float32) for i in range(n_classes)], axis=1)
    smooth = 1e-05
    w = [1.0] * n_classes if weight is None else weight
    loss = 0.0
    for i in range(n_classes):
        s = inputs[:, i].astype(jnp.float32)
        t = onehot[:, i]
        inter = jnp.sum(s * t)
        y = jnp.sum(t * t)
        z = jnp.sum(s * s)
        dice = 1.0 - (2.0 * inter + smooth) / (z + y + smooth)
        loss = loss + dice * w[i]
    return loss / n_classes


if __name__ == "__main__":
    key = jax.random.PRNGKey(0)
    ks = jax.random.split(key, 8)
    C = 4

    # 1) Small module-consistent shape: B=2, C=4, 16x16 (single tile, no mask).
    B, H, W = 2, 16, 16
    logits = jax.random.normal(ks[0], (B, C, H, W), dtype=jnp.float32)
    labels = jax.random.randint(ks[1], (B, 1, H, W), 0, C).astype(jnp.float32)

    out = jax.block_until_ready(dice_loss(logits, labels, C, softmax=True))
    ref = _reference_dice_loss(logits, labels, C, softmax=True)
    assert jnp.isfinite(out), "non-finite loss"
    assert jnp.allclose(out, ref, atol=2e-3, rtol=2e-3), (out, ref)

    probs = jax.nn.softmax(logits, axis=1)
    out = jax.block_until_ready(dice_loss(probs, labels, C, softmax=False))
    ref = _reference_dice_loss(probs, labels, C, softmax=False)
    assert jnp.allclose(out, ref, atol=1e-5, rtol=1e-5), (out, ref)

    wts = [0.1, 0.2, 0.3, 0.4]
    out = jax.block_until_ready(
        dice_loss(probs, labels, C, weight=wts, softmax=False))
    ref = _reference_dice_loss(probs, labels, C, weight=wts, softmax=False)
    assert jnp.allclose(out, ref, atol=1e-5, rtol=1e-5), (out, ref)

    # 2) B=1, 160x160: two parallel spatial splits (both TCs on v7x) and a
    #    masked ragged tail (R=200 rows of 128, rows_tile=104).
    logits2 = jax.random.normal(ks[2], (1, C, 160, 160), dtype=jnp.float32)
    labels2 = jax.random.randint(ks[3], (1, 1, 160, 160), 0, C).astype(jnp.float32)
    out = jax.block_until_ready(dice_loss(logits2, labels2, C, softmax=True))
    ref = _reference_dice_loss(logits2, labels2, C, softmax=True)
    assert jnp.allclose(out, ref, atol=2e-3, rtol=2e-3), (out, ref)

    # 3) Multi-tile reduction, unmasked fast path only: B=2, 512x512 ->
    #    R=2048, rows_tile=1024, two reduction steps per (batch), no mask code.
    logits3 = jax.random.normal(ks[4], (2, C, 512, 512), dtype=jnp.float32)
    labels3 = jax.random.randint(ks[5], (2, 1, 512, 512), 0, C).astype(jnp.float32)
    out = jax.block_until_ready(dice_loss(logits3, labels3, C, softmax=True))
    ref = _reference_dice_loss(logits3, labels3, C, softmax=True)
    assert jnp.allclose(out, ref, atol=2e-3, rtol=2e-3), (out, ref)

    # 4) Spatial size not a multiple of 128 (17x17): un-padded full-spatial
    #    block kernel (no copy of the score tensor).
    logits4 = jax.random.normal(ks[6], (2, C, 17, 17), dtype=jnp.float32)
    labels4 = jax.random.randint(ks[7], (2, 1, 17, 17), 0, C).astype(jnp.float32)
    out = jax.block_until_ready(dice_loss(logits4, labels4, C, softmax=True))
    ref = _reference_dice_loss(logits4, labels4, C, softmax=True)
    assert jnp.allclose(out, ref, atol=2e-3, rtol=2e-3), (out, ref)

    print("KERNEL_OK")
</pallas_src>

<mosaic_0001>
module attributes {stable_mosaic.version = 11 : i64} {
  func.func @_dice_tiles_kernel(%arg0: i32, %arg1: i32, %arg2: i32, %arg3: memref<1x4x2x128xf32, #tpu.memory_space<vmem>>, %arg4: memref<1x1x2x128xf32, #tpu.memory_space<vmem>>, %arg5: memref<1x4x128xf32, #tpu.memory_space<vmem>>, %arg6: memref<1x4x128xf32, #tpu.memory_space<vmem>>, %arg7: memref<1x4x128xf32, #tpu.memory_space<vmem>>, %arg8: memref<4x128xf32, #tpu.memory_space<vmem>>, %arg9: memref<4x128xf32, #tpu.memory_space<vmem>>, %arg10: memref<4x128xf32, #tpu.memory_space<vmem>>) attributes {dimension_semantics = [#tpu.dimension_semantics<parallel>, #tpu.dimension_semantics<parallel>, #tpu.dimension_semantics<arbitrary>], iteration_bounds = array<i64: 2, 1, 1>, scalar_prefetch = 0 : i64, scratch_operands = 3 : i64, tpu.core_type = #tpu.core_type<tc>, window_params = [{transform_indices = @transform_0, window_bounds = array<i64: 1, 4, 2, 128>}, {transform_indices = @transform_1, window_bounds = array<i64: 1, 1, 2, 128>}, {transform_indices = @transform_2, window_bounds = array<i64: 1, 4, 128>}, {transform_indices = @transform_3, window_bounds = array<i64: 1, 4, 128>}, {transform_indices = @transform_4, window_bounds = array<i64: 1, 4, 128>}]} {
    %c0_i32 = arith.constant 0 : i32
    %0 = arith.cmpi eq, %arg2, %c0_i32 : i32
    %1 = arith.extui %0 : i1 to i32
    %c0_i32_0 = arith.constant 0 : i32
    %2 = arith.cmpi ne, %1, %c0_i32_0 : i32
    scf.if %2 {
      %cst_39 = arith.constant 0.000000e+00 : f32
      %89 = vector.broadcast %cst_39 : f32 to vector<4x128xf32>
      %c0_40 = arith.constant 0 : index
      %c0_41 = arith.constant 0 : index
      %90 = vector.load %arg8[%c0_40, %c0_41] : memref<4x128xf32, #tpu.memory_space<vmem>>, vector<4x128xf32>
      tpu.vector_store %arg8[%c0_40, %c0_41], %89 {strides = array<i32>} : memref<4x128xf32, #tpu.memory_space<vmem>>, vector<4x128xf32>,
      %cst_42 = arith.constant 0.000000e+00 : f32
      %91 = vector.broadcast %cst_42 : f32 to vector<4x128xf32>
      %c0_43 = arith.constant 0 : index
      %c0_44 = arith.constant 0 : index
      %92 = vector.load %arg9[%c0_43, %c0_44] : memref<4x128xf32, #tpu.memory_space<vmem>>, vector<4x128xf32>
      tpu.vector_store %arg9[%c0_43, %c0_44], %91 {strides = array<i32>} : memref<4x128xf32, #tpu.memory_space<vmem>>, vector<4x128xf32>,
      %cst_45 = arith.constant 0.000000e+00 : f32
      %93 = vector.broadcast %cst_45 : f32 to vector<4x128xf32>
      %c0_46 = arith.constant 0 : index
      %c0_47 = arith.constant 0 : index
      %94 = vector.load %arg10[%c0_46, %c0_47] : memref<4x128xf32, #tpu.memory_space<vmem>>, vector<4x128xf32>
      tpu.vector_store %arg10[%c0_46, %c0_47], %93 {strides = array<i32>} : memref<4x128xf32, #tpu.memory_space<vmem>>, vector<4x128xf32>,
    } else {
    }
    %c0 = arith.constant 0 : index
    %c0_1 = arith.constant 0 : index
    %c0_2 = arith.constant 0 : index
    %c0_3 = arith.constant 0 : index
    %3 = vector.load %arg3[%c0, %c0_1, %c0_2, %c0_3] : memref<1x4x2x128xf32, #tpu.memory_space<vmem>>, vector<1x4x2x128xf32>
    %4 = vector.shape_cast %3 : vector<1x4x2x128xf32> to vector<4x2x128xf32>
    %c0_4 = arith.constant 0 : index
    %c0_5 = arith.constant 0 : index
    %c0_6 = arith.constant 0 : index
    %c0_7 = arith.constant 0 : index
    %5 = vector.load %arg4[%c0_4, %c0_5, %c0_6, %c0_7] : memref<1x1x2x128xf32, #tpu.memory_space<vmem>>, vector<1x1x2x128xf32>
    %6 = vector.shape_cast %5 : vector<1x1x2x128xf32> to vector<1x2x128xf32>
    %cst = arith.constant dense<0xFF800000> : vector<2x128xf32>
    %7 = vector.multi_reduction <maximumf>, %4, %cst [0] : vector<4x2x128xf32> to vector<2x128xf32>
    %8 = vector.shape_cast %7 : vector<2x128xf32> to vector<1x2x128xf32>
    %9 = vector.broadcast %8 : vector<1x2x128xf32> to vector<4x2x128xf32>
    %10 = arith.subf %4, %9 : vector<4x2x128xf32>
    %11 = math.exp %10 : vector<4x2x128xf32>
    %cst_8 = arith.constant dense<0.000000e+00> : vector<2x128xf32>
    %12 = vector.multi_reduction <add>, %11, %cst_8 [0] : vector<4x2x128xf32> to vector<2x128xf32>
    %13 = vector.shape_cast %12 : vector<2x128xf32> to vector<1x2x128xf32>
    %14 = tpu.reciprocal %13 {approx = true} : vector<1x2x128xf32> -> vector<1x2x128xf32>
    %15 = vector.broadcast %14 : vector<1x2x128xf32> to vector<4x2x128xf32>
    %16 = arith.mulf %11, %15 : vector<4x2x128xf32>
    %17 = vector.shape_cast %6 : vector<1x2x128xf32> to vector<2x128xf32>
    %18 = vector.extract_strided_slice %16 {offsets = [0, 0, 0], sizes = [1, 2, 128], strides = [1, 1, 1]} : vector<4x2x128xf32> to vector<1x2x128xf32>
    %19 = vector.shape_cast %18 : vector<1x2x128xf32> to vector<2x128xf32>
    %cst_9 = arith.constant 0.000000e+00 : f32
    %20 = vector.broadcast %cst_9 : f32 to vector<2x128xf32>
    %21 = arith.cmpf oeq, %17, %20 : vector<2x128xf32>
    %22 = arith.extui %21 : vector<2x128xi1> to vector<2x128xi32>
    %23 = arith.sitofp %22 : vector<2x128xi32> to vector<2x128xf32>
    %24 = arith.mulf %19, %23 : vector<2x128xf32>
    %cst_10 = arith.constant dense<0.000000e+00> : vector<128xf32>
    %25 = vector.multi_reduction <add>, %24, %cst_10 [0] : vector<2x128xf32> to vector<128xf32>
    %26 = vector.shape_cast %25 : vector<128xf32> to vector<1x128xf32>
    %27 = arith.mulf %19, %19 : vector<2x128xf32>
    %cst_11 = arith.constant dense<0.000000e+00> : vector<128xf32>
    %28 = vector.multi_reduction <add>, %27, %cst_11 [0] : vector<2x128xf32> to vector<128xf32>
    %29 = vector.shape_cast %28 : vector<128xf32> to vector<1x128xf32>
    %cst_12 = arith.constant dense<0.000000e+00> : vector<128xf32>
    %30 = vector.multi_reduction <add>, %23, %cst_12 [0] : vector<2x128xf32> to vector<128xf32>
    %31 = vector.shape_cast %30 : vector<128xf32> to vector<1x128xf32>
    %32 = vector.extract_strided_slice %16 {offsets = [1, 0, 0], sizes = [1, 2, 128], strides = [1, 1, 1]} : vector<4x2x128xf32> to vector<1x2x128xf32>
    %33 = vector.shape_cast %32 : vector<1x2x128xf32> to vector<2x128xf32>
    %cst_13 = arith.constant 1.000000e+00 : f32
    %34 = vector.broadcast %cst_13 : f32 to vector<2x128xf32>
    %35 = arith.cmpf oeq, %17, %34 : vector<2x128xf32>
    %36 = arith.extui %35 : vector<2x128xi1> to vector<2x128xi32>
    %37 = arith.sitofp %36 : vector<2x128xi32> to vector<2x128xf32>
    %38 = arith.mulf %33, %37 : vector<2x128xf32>
    %cst_14 = arith.constant dense<0.000000e+00> : vector<128xf32>
    %39 = vector.multi_reduction <add>, %38, %cst_14 [0] : vector<2x128xf32> to vector<128xf32>
    %40 = vector.shape_cast %39 : vector<128xf32> to vector<1x128xf32>
    %41 = arith.mulf %33, %33 : vector<2x128xf32>
    %cst_15 = arith.constant dense<0.000000e+00> : vector<128xf32>
    %42 = vector.multi_reduction <add>, %41, %cst_15 [0] : vector<2x128xf32> to vector<128xf32>
    %43 = vector.shape_cast %42 : vector<128xf32> to vector<1x128xf32>
    %cst_16 = arith.constant dense<0.000000e+00> : vector<128xf32>
    %44 = vector.multi_reduction <add>, %37, %cst_16 [0] : vector<2x128xf32> to vector<128xf32>
    %45 = vector.shape_cast %44 : vector<128xf32> to vector<1x128xf32>
    %46 = vector.extract_strided_slice %16 {offsets = [2, 0, 0], sizes = [1, 2, 128], strides = [1, 1, 1]} : vector<4x2x128xf32> to vector<1x2x128xf32>
    %47 = vector.shape_cast %46 : vector<1x2x128xf32> to vector<2x128xf32>
    %cst_17 = arith.constant 2.000000e+00 : f32
    %48 = vector.broadcast %cst_17 : f32 to vector<2x128xf32>
    %49 = arith.cmpf oeq, %17, %48 : vector<2x128xf32>
    %50 = arith.extui %49 : vector<2x128xi1> to vector<2x128xi32>
    %51 = arith.sitofp %50 : vector<2x128xi32> to vector<2x128xf32>
    %52 = arith.mulf %47, %51 : vector<2x128xf32>
    %cst_18 = arith.constant dense<0.000000e+00> : vector<128xf32>
    %53 = vector.multi_reduction <add>, %52, %cst_18 [0] : vector<2x128xf32> to vector<128xf32>
    %54 = vector.shape_cast %53 : vector<128xf32> to vector<1x128xf32>
    %55 = arith.mulf %47, %47 : vector<2x128xf32>
    %cst_19 = arith.constant dense<0.000000e+00> : vector<128xf32>
    %56 = vector.multi_reduction <add>, %55, %cst_19 [0] : vector<2x128xf32> to vector<128xf32>
    %57 = vector.shape_cast %56 : vector<128xf32> to vector<1x128xf32>
    %cst_20 = arith.constant dense<0.000000e+00> : vector<128xf32>
    %58 = vector.multi_reduction <add>, %51, %cst_20 [0] : vector<2x128xf32> to vector<128xf32>
    %59 = vector.shape_cast %58 : vector<128xf32> to vector<1x128xf32>
    %60 = vector.extract_strided_slice %16 {offsets = [3, 0, 0], sizes = [1, 2, 128], strides = [1, 1, 1]} : vector<4x2x128xf32> to vector<1x2x128xf32>
    %61 = vector.shape_cast %60 : vector<1x2x128xf32> to vector<2x128xf32>
    %cst_21 = arith.constant 3.000000e+00 : f32
    %62 = vector.broadcast %cst_21 : f32 to vector<2x128xf32>
    %63 = arith.cmpf oeq, %17, %62 : vector<2x128xf32>
    %64 = arith.extui %63 : vector<2x128xi1> to vector<2x128xi32>
    %65 = arith.sitofp %64 : vector<2x128xi32> to vector<2x128xf32>
    %66 = arith.mulf %61, %65 : vector<2x128xf32>
    %cst_22 = arith.constant dense<0.000000e+00> : vector<128xf32>
    %67 = vector.multi_reduction <add>, %66, %cst_22 [0] : vector<2x128xf32> to vector<128xf32>
    %68 = vector.shape_cast %67 : vector<128xf32> to vector<1x128xf32>
    %69 = arith.mulf %61, %61 : vector<2x128xf32>
    %cst_23 = arith.constant dense<0.000000e+00> : vector<128xf32>
    %70 = vector.multi_reduction <add>, %69, %cst_23 [0] : vector<2x128xf32> to vector<128xf32>
    %71 = vector.shape_cast %70 : vector<128xf32> to vector<1x128xf32>
    %cst_24 = arith.constant dense<0.000000e+00> : vector<128xf32>
    %72 = vector.multi_reduction <add>, %65, %cst_24 [0] : vector<2x128xf32> to vector<128xf32>
    %73 = vector.shape_cast %72 : vector<128xf32> to vector<1x128xf32>
    %c0_25 = arith.constant 0 : index
    %c0_26 = arith.constant 0 : index
    %74 = vector.load %arg8[%c0_25, %c0_26] : memref<4x128xf32, #tpu.memory_space<vmem>>, vector<4x128xf32>
    %75 = tpu.concatenate %26, %40, %54, %68 in 0 : vector<1x128xf32>, vector<1x128xf32>, vector<1x128xf32>, vector<1x128xf32> -> vector<4x128xf32>
    %76 = arith.addf %74, %75 : vector<4x128xf32>
    %c0_27 = arith.constant 0 : index
    %c0_28 = arith.constant 0 : index
    %77 = vector.load %arg8[%c0_27, %c0_28] : memref<4x128xf32, #tpu.memory_space<vmem>>, vector<4x128xf32>
    tpu.vector_store %arg8[%c0_27, %c0_28], %76 {strides = array<i32>} : memref<4x128xf32, #tpu.memory_space<vmem>>, vector<4x128xf32>,
    %c0_29 = arith.constant 0 : index
    %c0_30 = arith.constant 0 : index
    %78 = vector.load %arg9[%c0_29, %c0_30] : memref<4x128xf32, #tpu.memory_space<vmem>>, vector<4x128xf32>
    %79 = tpu.concatenate %29, %43, %57, %71 in 0 : vector<1x128xf32>, vector<1x128xf32>, vector<1x128xf32>, vector<1x128xf32> -> vector<4x128xf32>
    %80 = arith.addf %78, %79 : vector<4x128xf32>
    %c0_31 = arith.constant 0 : index
    %c0_32 = arith.constant 0 : index
    %81 = vector.load %arg9[%c0_31, %c0_32] : memref<4x128xf32, #tpu.memory_space<vmem>>, vector<4x128xf32>
    tpu.vector_store %arg9[%c0_31, %c0_32], %80 {strides = array<i32>} : memref<4x128xf32, #tpu.memory_space<vmem>>, vector<4x128xf32>,
    %c0_33 = arith.constant 0 : index
    %c0_34 = arith.constant 0 : index
    %82 = vector.load %arg10[%c0_33, %c0_34] : memref<4x128xf32, #tpu.memory_space<vmem>>, vector<4x128xf32>
    %83 = tpu.concatenate %31, %45, %59, %73 in 0 : vector<1x128xf32>, vector<1x128xf32>, vector<1x128xf32>, vector<1x128xf32> -> vector<4x128xf32>
    %84 = arith.addf %82, %83 : vector<4x128xf32>
    %c0_35 = arith.constant 0 : index
    %c0_36 = arith.constant 0 : index
    %85 = vector.load %arg10[%c0_35, %c0_36] : memref<4x128xf32, #tpu.memory_space<vmem>>, vector<4x128xf32>
    tpu.vector_store %arg10[%c0_35, %c0_36], %84 {strides = array<i32>} : memref<4x128xf32, #tpu.memory_space<vmem>>, vector<4x128xf32>,
    %c0_i32_37 = arith.constant 0 : i32
    %86 = arith.cmpi eq, %arg2, %c0_i32_37 : i32
    %87 = arith.extui %86 : i1 to i32
    %c0_i32_38 = arith.constant 0 : i32
    %88 = arith.cmpi ne, %87, %c0_i32_38 : i32
    scf.if %88 {
      %c0_39 = arith.constant 0 : index
      %c0_40 = arith.constant 0 : index
      %89 = vector.load %arg8[%c0_39, %c0_40] : memref<4x128xf32, #tpu.memory_space<vmem>>, vector<4x128xf32>
      %c0_41 = arith.constant 0 : index
      %c0_42 = arith.constant 0 : index
      %c0_43 = arith.constant 0 : index
      %90 = vector.load %arg5[%c0_41, %c0_42, %c0_43] : memref<1x4x128xf32, #tpu.memory_space<vmem>>, vector<1x4x128xf32>
      %91 = vector.shape_cast %90 : vector<1x4x128xf32> to vector<4x128xf32>
      %92 = vector.shape_cast %89 : vector<4x128xf32> to vector<1x4x128xf32>
      tpu.vector_store %arg5[%c0_41, %c0_42, %c0_43], %92 {strides = array<i32>} : memref<1x4x128xf32, #tpu.memory_space<vmem>>, vector<1x4x128xf32>,
      %c0_44 = arith.constant 0 : index
      %c0_45 = arith.constant 0 : index
      %93 = vector.load %arg9[%c0_44, %c0_45] : memref<4x128xf32, #tpu.memory_space<vmem>>, vector<4x128xf32>
      %c0_46 = arith.constant 0 : index
      %c0_47 = arith.constant 0 : index
      %c0_48 = arith.constant 0 : index
      %94 = vector.load %arg6[%c0_46, %c0_47, %c0_48] : memref<1x4x128xf32, #tpu.memory_space<vmem>>, vector<1x4x128xf32>
      %95 = vector.shape_cast %94 : vector<1x4x128xf32> to vector<4x128xf32>
      %96 = vector.shape_cast %93 : vector<4x128xf32> to vector<1x4x128xf32>
      tpu.vector_store %arg6[%c0_46, %c0_47, %c0_48], %96 {strides = array<i32>} : memref<1x4x128xf32, #tpu.memory_space<vmem>>, vector<1x4x128xf32>,
      %c0_49 = arith.constant 0 : index
      %c0_50 = arith.constant 0 : index
      %97 = vector.load %arg10[%c0_49, %c0_50] : memref<4x128xf32, #tpu.memory_space<vmem>>, vector<4x128xf32>
      %c0_51 = arith.constant 0 : index
      %c0_52 = arith.constant 0 : index
      %c0_53 = arith.constant 0 : index
      %98 = vector.load %arg7[%c0_51, %c0_52, %c0_53] : memref<1x4x128xf32, #tpu.memory_space<vmem>>, vector<1x4x128xf32>
      %99 = vector.shape_cast %98 : vector<1x4x128xf32> to vector<4x128xf32>
      %100 = vector.shape_cast %97 : vector<4x128xf32> to vector<1x4x128xf32>
      tpu.vector_store %arg7[%c0_51, %c0_52, %c0_53], %100 {strides = array<i32>} : memref<1x4x128xf32, #tpu.memory_space<vmem>>, vector<1x4x128xf32>,
    } else {
    }
    return
  }
  func.func @transform_0(%arg0: i32, %arg1: i32, %arg2: i32) -> (i32, i32, i32, i32) {
    %c1_i32 = arith.constant 1 : i32
    %0 = arith.muli %arg1, %c1_i32 : i32
    %1 = arith.addi %0, %arg2 : i32
    %c0_i32 = arith.constant 0 : i32
    %c0_i32_0 = arith.constant 0 : i32
    %c0_i32_1 = arith.constant 0 : i32
    return %arg0, %c0_i32, %1, %c0_i32_0 : i32, i32, i32, i32
  }
  func.func @transform_1(%arg0: i32, %arg1: i32, %arg2: i32) -> (i32, i32, i32, i32) {
    %c1_i32 = arith.constant 1 : i32
    %0 = arith.muli %arg1, %c1_i32 : i32
    %1 = arith.addi %0, %arg2 : i32
    %c0_i32 = arith.constant 0 : i32
    %c0_i32_0 = arith.constant 0 : i32
    %c0_i32_1 = arith.constant 0 : i32
    return %arg0, %c0_i32, %1, %c0_i32_0 : i32, i32, i32, i32
  }
  func.func @transform_2(%arg0: i32, %arg1: i32, %arg2: i32) -> (i32, i32, i32) {
    %c1_i32 = arith.constant 1 : i32
    %0 = arith.muli %arg0, %c1_i32 : i32
    %1 = arith.addi %0, %arg1 : i32
    %c0_i32 = arith.constant 0 : i32
    %c0_i32_0 = arith.constant 0 : i32
    %c0_i32_1 = arith.constant 0 : i32
    return %1, %c0_i32, %c0_i32_0 : i32, i32, i32
  }
  func.func @transform_3(%arg0: i32, %arg1: i32, %arg2: i32) -> (i32, i32, i32) {
    %c1_i32 = arith.constant 1 : i32
    %0 = arith.muli %arg0, %c1_i32 : i32
    %1 = arith.addi %0, %arg1 : i32
    %c0_i32 = arith.constant 0 : i32
    %c0_i32_0 = arith.constant 0 : i32
    %c0_i32_1 = arith.constant 0 : i32
    return %1, %c0_i32, %c0_i32_0 : i32, i32, i32
  }
  func.func @transform_4(%arg0: i32, %arg1: i32, %arg2: i32) -> (i32, i32, i32) {
    %c1_i32 = arith.constant 1 : i32
    %0 = arith.muli %arg0, %c1_i32 : i32
    %1 = arith.addi %0, %arg1 : i32
    %c0_i32 = arith.constant 0 : i32
    %c0_i32_0 = arith.constant 0 : i32
    %c0_i32_1 = arith.constant 0 : i32
    return %1, %c0_i32, %c0_i32_0 : i32, i32, i32
  }
}

</mosaic_0001>

<bundles_post_ra>
// kernel: tpu_custom_call.1
= control target key start
LH: loop header
LB: loop body
LE: loop exit
PB: predicated region body
PF: predicated region fallthrough
CT: control target
= control target key end

     0   :  { %s1418_s0 = inlined_call_operand.hbm [shape: f32[2,4,2,128], index: 0, kind: input, shape index: {}]   ;;  %s1419_s1 = inlined_call_operand.hbm [shape: f32[2,1,2,128], index: 1, kind: input, shape index: {}]   ;;  %s1420_s2 = inlined_call_operand.hbm [shape: f32[2,4,128], index: 2, kind: output, shape index: {0}]   ;;  %s1421_s3 = inlined_call_operand.hbm [shape: f32[2,4,128], index: 3, kind: output, shape index: {1}]   ;;  %s1422_s4 = inlined_call_operand.hbm [shape: f32[2,4,128], index: 4, kind: output, shape index: {2}]  }
   0x1   :  { %1428 = sst [smem:[#allocation19_spill]] %s1418_s0 }
   0x2   :  { %1429 = sst [smem:[#allocation20_spill]] %s1419_s1 }
   0x3   :  { %10 = vsyncpa [#allocation6], 0 }
   0x4   :  { %12 = vsyncpa [#allocation6 + $0x1], 0 }
   0x5   :  { %13 = vsyncpa [#allocation9], 0 }
   0x6   :  { %15 = vsyncpa [#allocation9 + $0x1], 0 }
   0x7   :  { %16 = vsyncpa [#allocation7], 0 }
   0x8   :  { %18 = vsyncpa [#allocation7 + $0x1], 0 }
   0x9   :  { %19 = vsyncpa [#allocation12], 0 }
   0xa   :  { %21 = vsyncpa [#allocation12 + $0x1], 0  ;;  %s1075_s15 = smov 0   ;;  %s1077_s16 = smov 0  }
   0xb   :  { %s1079_s17 = smov 0   ;;  %s1081_s18 = smov 0  }
   0xc   :  { %s1083_s19 = smov 0   ;;  %s1085_s20 = smov 0  }
   0xd LB: > { %s1106_s21 = sadd.s32 4294967295, %s1040_s20   ;;  %s1424_s22 = sadd.s32 4294967294, %s1040_s20   ;;  %s1040_s20 = sphi %s1085_s20, %s27_s20   ;;  %s1036_s19 = sphi %s1083_s19, %s1452_s19   ;;  %s1032_s18 = sphi %s1081_s18, %s1451_s18   ;;  %s1028_s17 = sphi %s1079_s17, %s1450_s17   ;;  %s1024_s16 = sphi %s1077_s16, %s1449_s16   ;;  %s1020_s15 = sphi %s1075_s15, %s1448_s15  }
   0xe   : > { %s46_s23 = sadd.s32 1, %s1036_s19  ;;  %s57_s24 = sadd.s32 1, %s1028_s17 }
   0xf   : > { %p48_p0 = scmp.ge.s32.totalorder %s46_s23, 2  ;;  %p64_p1 = scmp.ne.s32.totalorder %s1028_s17, %s1024_s16 }
  0x10   : > { %p65_p2 = scmp.eq.s32.totalorder %s1040_s20, 0  ;;  %p70_p3 = scmp.ne.s32.totalorder %s1024_s16, %s1020_s15 }
  0x11   : > { %s1454_s23 = smov (%p48_p0, %s46_s23), 0  ;;  %p71_p5 = scmp.eq.s32.totalorder %s1106_s21, 0 }
  0x12   : > { %1430 = sst [smem:[#allocation18_spill]] %s1454_s23  ;;  %p1118_p4 = por %p65_p2, %p64_p1 }
  0x13   : > { %s52_s26 = ssub.s32 %s1036_s19, %s1454_s23  ;;  %p126_p6 = scmp.eq.s32.totalorder %s1106_s21, 1 }
  0x14   : > { %p55_p7 = scmp.eq.s32.totalorder %s52_s26, 0  ;;  %p1126_p8 = por %p71_p5, %p70_p3 }
  0x15   : > { %p1130_p9 = por %p126_p6, %p64_p1  ;;  %p132_p10 = scmp.eq.s32.totalorder %s1424_s22, 1 }
  0x16   : > { %s1432_s27 = scalar_select %p1126_p8, 1, 0 }
  0x17   : > { %s1433_s28 = scalar_select %p1130_p9, 1, 0 }
  0x18   : > { %s1137_s29 = scalar_select %p55_p7, %s1028_s17, %s57_s24  }
  0x19   : > { %p1139_p11 = por %p132_p10, %p70_p3  ;;  %p771_p13 = scmp.lt.s32.totalorder %s1040_s20, 2 }
  0x1a   : > { %s1146_s5 = sand.u32 1, %s1028_s17   ;;  %s743_s7 = sshll.u32 %s1036_s19, 7 }
  0x1b   : > { %s1434_s30 = scalar_select %p1139_p11, 1, 0 }
  0x1c   : > { %s720_s6 = sshll.u32 %s1146_s5, 3  ;;  %s1435_s0 = sld [smem:[#allocation19_spill]] }
  0x1d   : > { %s212_s11 = scalar_lea.vmem [#allocation5], %s720_s6  ;;  %p1159_p0 = pnand %p771_p13, %p1118_p4 }
  0x1e   : > { %s221_s12 = sshll.u32 %s212_s11, 4  ;;  %s209_s14 = scalar_lea.sflag [#allocation6], %s1146_s5  ;;  %s1155_s12 = int_to_ptr.vmem [resolvable:$true] %s221_s12 }
  0x1f   : > { %p836_p3 = pneg %p1159_p0 }
  0x22   : > { %s1153_s10 = scalar_lea.hbm %s1435_s0, %s743_s7  ;;  %s839_s25 = scalar_lea.hbm %s1435_s0, 256 }
  0x23   : > { %s834_s24 = scalar_lea.hbm %s1153_s10, 128  ;;  %p840_p4 = scmp.lt.u32.totalorder %s1153_s10, %s1435_s0 }
  0x24   : > { %p835_p2 = scmp.ne.s32.totalorder %s1153_s10, %s834_s24  ;;  %p841_p7 = scmp.lt.u32.totalorder %s839_s25, %s834_s24 }
  0x25   : > { %p843_p13 = scmp.lt.u32.totalorder %s834_s24, %s1153_s10 }
  0x26   : > { %p837_p5 = pnand %p836_p3, %p835_p2  ;;  %p842_p10 = por %p841_p7, %p840_p4 }
  0x28   : > { %p838_p6 = pneg %p837_p5  ;;  %p844_p12 = por %p843_p13, %p842_p10 }
  0x2a   : > { %p845_p1 = pnand %p844_p12, %p838_p6 }
  0x2c   : > { %848 = shalt.err (!%p845_p1)
}
  0x2d   : > { %s849_s9 = scalar_lea.vmem %s1155_s12, 128  ;;  %s1042_s11 = smov [#allocation5]  }
  0x2e   : > { %p850_p2 = scmp.ne.s32.totalorder %s1155_s12, %s849_s9  ;;  %s854_s26 = sshll.u32 %s1042_s11, 4  ;;  %s855_s26 = int_to_ptr.vmem [resolvable:$false] %s854_s26 }
  0x2f   : > { %s856_s6 = scalar_lea.vmem %s855_s26, 256  ;;  %p857_p9 = scmp.lt.s32.totalorder %s1155_s12, %s855_s26 }
  0x30   : > { %p852_p5 = pnand %p850_p2, %p836_p3  ;;  %p858_p4 = scmp.lt.s32.totalorder %s856_s6, %s849_s9 }
  0x32   : > { %p853_p11 = pneg %p852_p5  ;;  %p859_p7 = por %p858_p4, %p857_p9 }
  0x34   : > { %p860_p10 = pnand %p859_p7, %p853_p11 }
  0x36   : > { %863 = shalt.err (!%p860_p10)
}
  0x37   : > { %s1043_s24 = smov 32   ;;  %s1044_s25 = smov 2  }
  0x38   : > { %757 = dma.hbm_to_vmem [thread:$0]  (!%p1159_p0), %s1153_s10, 128, %s1155_s12, %s209_s14, %s1043_s24, %s1043_s24, %s1044_s25  }
  0x39   : > { %p249_p12 = scmp.lt.s32.totalorder %s1040_s20, 3  ;;  %s723_s7 = sshll.u32 %s1146_s5, 1 }
  0x3a   : > { %s724_s8 = sshll.u32 %s1036_s19, 5  ;;  %p1437_p9 = scmp.ge.s32.totalorder %s1040_s20, 1 }
  0x3b   : > { %s1439_s1 = sld [smem:[#allocation20_spill]]  ;;  %s235_s22 = scalar_lea.vmem [#allocation8], %s723_s7 }
  0x3c   : > { %p1197_p11 = pnand %p1437_p9, %p249_p12  ;;  %s244_s0 = sshll.u32 %s235_s22, 4  ;;  %s245_s0 = int_to_ptr.vmem [resolvable:$true] %s244_s0 }
  0x3d   : > { %s232_s10 = scalar_lea.sflag [#allocation9], %s1146_s5 }
  0x3e   : > { %s1438_s9 = scalar_select %p1197_p11, 1, 0 }
  0x41   : > { %s1204_s6 = scalar_lea.hbm %s1439_s1, %s724_s8  ;;  %s869_s25 = scalar_lea.hbm %s1439_s1, 64 }
  0x42   : > { %s864_s12 = scalar_lea.hbm %s1204_s6, 32  ;;  %p870_p2 = scmp.lt.u32.totalorder %s1204_s6, %s1439_s1 }
  0x43   : > { %p865_p1 = scmp.ne.s32.totalorder %s1204_s6, %s864_s12  ;;  %p871_p5 = scmp.lt.u32.totalorder %s869_s25, %s864_s12 }
  0x44   : > { %p873_p7 = scmp.lt.u32.totalorder %s864_s12, %s1204_s6 }
  0x45   : > { %p867_p6 = pnand %p865_p1, %p836_p3  ;;  %p872_p4 = por %p871_p5, %p870_p2 }
  0x47   : > { %p868_p13 = pneg %p867_p6  ;;  %p874_p10 = por %p873_p7, %p872_p4 }
  0x49   : > { %p875_p12 = pnand %p874_p10, %p868_p13 }
  0x4b   : > { %878 = shalt.err (!%p875_p12)
}
  0x4c   : > { %s879_s22 = scalar_lea.vmem %s245_s0, 32  ;;  %s1045_s5 = smov [#allocation8]  }
  0x4d   : > { %p880_p9 = scmp.ne.s32.totalorder %s245_s0, %s879_s22  ;;  %s884_s7 = sshll.u32 %s1045_s5, 4  ;;  %s885_s7 = int_to_ptr.vmem [resolvable:$false] %s884_s7 }
  0x4e   : > { %s886_s26 = scalar_lea.vmem %s885_s7, 64  ;;  %p887_p8 = scmp.lt.s32.totalorder %s245_s0, %s885_s7 }
  0x4f   : > { %p882_p1 = pnand %p880_p9, %p836_p3  ;;  %p888_p11 = scmp.lt.s32.totalorder %s886_s26, %s879_s22 }
  0x51   : > { %p883_p6 = pneg %p882_p1  ;;  %p889_p2 = por %p888_p11, %p887_p8 }
  0x53   : > { %p890_p5 = pnand %p889_p2, %p883_p6 }
  0x55   : > { %893 = shalt.err (!%p890_p5)
}
  0x56   : > { %760 = dma.hbm_to_vmem [thread:$0]  (!%p1159_p0), %s1204_s6, 32, %s245_s0, %s232_s10  }
  0x57   : > { %p1440_p13 = scmp.ne.s32.totalorder %s1438_s9, 0 }
  0x58   : > { %s1229_s12 = sand.u32 (!%p1440_p13), 1, %s1024_s16   ;;  %p1441_p3 = scmp.ne.s32.totalorder (!%p1440_p13), %s1432_s27, 0 }
  0x59   : > { %253 = sbr.rel (%p1440_p13) target bundleno = 231 (0xe7), region = 28  ;;  %s726_s14 = sshll.u32 (!%p1440_p13), %s1229_s12, 3 }
  0x5a   : > { %s256_s24 = scalar_lea.sflag (!%p1440_p13), [#allocation6], %s1229_s12  ;;  %s259_s25 = scalar_lea.vmem (!%p1440_p13), [#allocation5], %s726_s14 }
  0x60   : > { %1003 = dma.done.wait (%p1441_p3), %s256_s24, 128  }
  0x61   : > { %1005 = vsyncadd (%p1441_p3), %s256_s24, 4294967168  ;;  %s727_s0 = sshll.u32 %s1229_s12, 1  ;;  %s265_s13 = scalar_lea.sflag [#allocation9], %s1229_s12 }
  0x62   : > { %s268_s9 = scalar_lea.vmem [#allocation8], %s727_s0 }
  0x63   : > { %1007 = dma.done.wait (%p1441_p3), %s265_s13, 32  }
  0x64   : > { %1009 = vsyncadd (%p1441_p3), %s265_s13, 4294967264  ;;  %v1046_v0 = vmov 0.0   ;;  %vm325_vm0 = vcmask 1041408   ;;  %v320_v1 = vld [vmem:[%s259_s25] sm:$0x3]  ;;  %vm462_vm5 = vcmask 1040384  }
  0x65   : > { %318 = vst [vmem:[#allocation3] sm:$0xf] %v1046_v0  ;;  %317 = vst [vmem:[#allocation2] sm:$0xf] %v1046_v0  ;;  %v321_v2 = vld [vmem:[%s259_s25 + $0x2] sm:$0x3] }
  0x66   : > { %319 = vst [vmem:[#allocation4] sm:$0xf] %v1046_v0  ;;  %v322_v3 = vld [vmem:[%s259_s25 + $0x4] sm:$0x3]  ;;  %v323_v4 = vld [vmem:[%s259_s25 + $0x6] sm:$0x3] }
  0x67   : > { %v326_v5 = vsel %vm325_vm0, %v320_v1, -inf  ;;  %v327_v6 = vsel %vm325_vm0, %v321_v2, -inf  ;;  %v328_v7 = vsel %vm325_vm0, %v322_v3, -inf  ;;  %v329_v8 = vsel %vm325_vm0, %v323_v4, -inf  ;;  %v324_v10 = vld [vmem:[%s268_s9] sm:$0x3] }
  0x68   : > { %v330_v9 = vmax.f32 %v326_v5, %v327_v6  ;;  %v331_v11 = vmax.f32 %v328_v7, %v329_v8  ;;  %vm357_vm1 = vcmp.eq.f32.partialorder %v324_v10, 0.0  ;;  %vm383_vm2 = vcmp.eq.f32.partialorder %v324_v10, 1.0  ;;  %s1271_s27 = sshll.u32 %s1229_s12, 2  ;;  %s495_s5 = sand.u32 1, %s1106_s21  }
  0x69   : > { %vm409_vm3 = vcmp.eq.f32.partialorder %v324_v10, 2.0  ;;  %v1247_v12 = vsel %vm357_vm1, 1.0, %v1046_v0  ;;  %v1249_v13 = vsel %vm383_vm2, 1.0, %v1046_v0  ;;  %vm435_vm4 = vcmp.eq.f32.partialorder %v324_v10, 3.0  ;;  %s307_s6 = scalar_lea.vmem [#allocation13], %s1271_s27  ;;  %s300_s10 = scalar_lea.vmem [#allocation11], %s1271_s27 }
  0x6a   : > { %v1251_v14 = vsel %vm409_vm3, 1.0, %v1046_v0  ;;  %v332_v15 = vmax.f32 %v330_v9, %v331_v11  ;;  %v1253_v16 = vsel %vm435_vm4, 1.0, %v1046_v0  ;;  %v376_v17 = vsel %vm325_vm0, %v1247_v12, 0.0  ;;  %s529_s8 = sshll.u32 %s300_s10, 4  ;;  %s1426_s11 = scalar_lea.vmem [#allocation10], %s1271_s27  ;;  %s1302_s8 = int_to_ptr.vmem [resolvable:$true] %s529_s8 }
  0x6b   : > { %v402_v18 = vsel %vm325_vm0, %v1249_v13, 0.0  ;;  %v377_v19 = vrot.slane %v376_v17, 4  ;;  %v428_v21 = vsel %vm325_vm0, %v1251_v14, 0.0  ;;  %v454_v22 = vsel %vm325_vm0, %v1253_v16, 0.0  ;;  %s515_s22 = sshll.u32 %s1426_s11, 4  ;;  %s738_s7 = sshll.u32 %s1032_s18, 6  ;;  %s1304_s22 = int_to_ptr.vmem [resolvable:$true] %s515_s22 }
  0x6c   : > { %v403_v20 = vrot.slane %v402_v18, 4  ;;  %v333_v23 = vsub.f32 %v320_v1, %v332_v15  ;;  %v334_v24 = vsub.f32 %v321_v2, %v332_v15  ;;  %v335_v25 = vsub.f32 %v322_v3, %v332_v15  ;;  %s543_s26 = sshll.u32 %s307_s6, 4  ;;  %s1309_s25 = scalar_lea.hbm %s1421_s3, %s738_s7  ;;  %s1311_s26 = int_to_ptr.vmem [resolvable:$true] %s543_s26 }
  0x6d   : > { %v336_v26 = vsub.f32 %v323_v4, %v332_v15  ;;  %v378_v27 = vadd.f32 %v377_v19, %v376_v17  ;;  %v429_v29 = vrot.slane %v428_v21, 4  ;;  %v455_v30 = vrot.slane %v454_v22, 4  ;;  %v475_v54 = vld [vmem:[#allocation4] sm:$0xf]  ;;  %s1316_s18 = scalar_lea.hbm %s1422_s4, %s738_s7  ;;  %s1323_s11 = scalar_lea.sflag [#allocation12], %s495_s5 }
  0x6e   : > { %v404_v28 = vadd.f32 %v403_v20, %v402_v18  ;;  %v337_v31 = vmul.f32 1.442695, %v333_v23  ;;  %v339_v32 = vmul.f32 1.442695, %v334_v24  ;;  %v341_v33 = vmul.f32 1.442695, %v335_v25 }
  0x6f   : > { %v343_v34 = vmul.f32 1.442695, %v336_v26  ;;  %v379_v35 = vrot.slane %v378_v27, 2  ;;  %v430_v37 = vadd.f32 %v429_v29, %v428_v21  ;;  %v456_v38 = vadd.f32 %v455_v30, %v454_v22  ;;  %s894_s14 = scalar_lea.vmem %s1302_s8, 64  ;;  %p1442_p0 = scmp.ne.s32.totalorder %s1433_s28, 0 }
  0x70   : > { %v405_v36 = vrot.slane %v404_v28, 2  ;;  %824 = vpow2.f32 %v337_v31  ;;  %vm465_vm6 = vcmask 1042432   ;;  %p895_p8 = scmp.ne.s32.totalorder %s1302_s8, %s894_s14  ;;  %s1047_s24 = smov [#allocation11]  }
  0x71   : > { %826 = vpow2.f32 %v339_v32  ;;  %v380_v39 = vadd.f32 %v379_v35, %v378_v27  ;;  %v431_v41 = vrot.slane %v430_v37, 2  ;;  %v457_v42 = vrot.slane %v456_v38, 2  ;;  %s898_s1 = sshll.u32 %s1047_s24, 4  ;;  %s899_s1 = int_to_ptr.vmem [resolvable:$false] %s898_s1 }
  0x72   : > { %v406_v40 = vadd.f32 %v405_v36, %v404_v28  ;;  %828 = vpow2.f32 %v341_v33  ;;  %p896_p11 = pnand %p895_p8, %p1442_p0  ;;  %s900_s23 = scalar_lea.vmem %s899_s1, 128 }
  0x73   : > { %830 = vpow2.f32 %v343_v34  ;;  %v381_v43 = vrot.slane %v380_v39, 1  ;;  %v432_v45 = vadd.f32 %v431_v41, %v430_v37  ;;  %v458_v46 = vadd.f32 %v457_v42, %v456_v38  ;;  %p901_p7 = scmp.lt.s32.totalorder %s1302_s8, %s899_s1  ;;  %p902_p10 = scmp.lt.s32.totalorder %s900_s23, %s894_s14 }
  0x74   : > { %v407_v44 = vrot.slane %v406_v40, 1  ;;  %p897_p4 = pneg %p896_p11 }
  0x75   : > { %v382_v47 = vadd.f32 %v381_v43, %v380_v39  ;;  %v433_v49 = vrot.slane %v432_v45, 1  ;;  %v459_v50 = vrot.slane %v458_v46, 1  ;;  %p903_p12 = por %p902_p10, %p901_p7 }
  0x76   : > { %v408_v48 = vadd.f32 %v407_v44, %v406_v40 }
  0x77   : > { %v434_v51 = vadd.f32 %v433_v49, %v432_v45  ;;  %v460_v53 = vadd.f32 %v459_v50, %v458_v46  ;;  %p904_p9 = pnand %p903_p12, %p897_p4 }
  0x78   : > { %v476_v52 = vsel %vm462_vm5, %v382_v47, %v408_v48 }
  0x79   : > { %v477_v55 = vsel %vm325_vm0, %v476_v52, %v434_v51 }
  0x7a   : > { %v825_v56 = vpop.eup %824  ;;  %v478_v57 = vsel %vm465_vm6, %v477_v55, %v460_v53 }
  0x7b   : > { %v827_v58 = vpop.eup %826  ;;  %v345_v59 = vsel %vm325_vm0, %v825_v56, 0.0  ;;  %v479_v60 = vadd.f32 %v478_v57, %v475_v54 }
  0x7c   : > { %v829_v61 = vpop.eup %828  ;;  %v346_v62 = vsel %vm325_vm0, %v827_v58, 0.0 }
  0x7d   : > { %v831_v63 = vpop.eup %830  ;;  %v347_v0 = vadd.f32 %v346_v62, %v345_v59  ;;  %v348_v1 = vsel %vm325_vm0, %v829_v61, 0.0  ;;  %480 = vst [vmem:[#allocation4] sm:$0xf] %v479_v60 }
  0x7e   : > { %v350_v2 = vsel %vm325_vm0, %v831_v63, 0.0 }
  0x7f   : > { %v349_v3 = vadd.f32 %v348_v1, %v347_v0 }
  0x81   : > { %v351_v4 = vadd.f32 %v350_v2, %v349_v3 }
  0x83   : > { %832 = vrcp.f32 %v351_v4 }
  0x84   : > { %v488_v5 = vld [vmem:[#allocation4] sm:$0xf] }
  0x85   : > { %489 = vst [vmem:[%s307_s6] sm:$0xf] %v488_v5  ;;  %s1321_s6 = scalar_lea.hbm %s1420_s2, %s738_s7 }
  0x8d   : > { %v833_v6 = vpop.eup %832 }
  0x8e   : > { %v353_v7 = vmul.f32 %v833_v6, %v825_v56  ;;  %v354_v8 = vmul.f32 %v833_v6, %v827_v58  ;;  %v355_v9 = vmul.f32 %v833_v6, %v829_v61  ;;  %v356_v10 = vmul.f32 %v833_v6, %v831_v63 }
  0x90   : > { %v368_v11 = vmul.f32 %v353_v7, %v353_v7  ;;  %v394_v15 = vmul.f32 %v354_v8, %v354_v8  ;;  %v420_v17 = vmul.f32 %v355_v9, %v355_v9  ;;  %v446_v18 = vmul.f32 %v356_v10, %v356_v10 }
  0x91   : > { %v360_v19 = vmul.f32 %v1247_v12, %v353_v7  ;;  %v386_v20 = vmul.f32 %v1249_v13, %v354_v8  ;;  %v412_v21 = vmul.f32 %v1251_v14, %v355_v9  ;;  %v438_v22 = vmul.f32 %v1253_v16, %v356_v10  ;;  %v469_v7 = vld [vmem:[#allocation3] sm:$0xf] }
  0x92   : > { %v369_v23 = vsel %vm325_vm0, %v368_v11, 0.0  ;;  %v395_v24 = vsel %vm325_vm0, %v394_v15, 0.0  ;;  %v421_v25 = vsel %vm325_vm0, %v420_v17, 0.0  ;;  %v447_v26 = vsel %vm325_vm0, %v446_v18, 0.0 }
  0x93   : > { %v370_v27 = vrot.slane %v369_v23, 4  ;;  %v396_v28 = vrot.slane %v395_v24, 4  ;;  %v422_v29 = vrot.slane %v421_v25, 4  ;;  %v448_v30 = vrot.slane %v447_v26, 4 }
  0x94   : > { %v361_v12 = vsel %vm325_vm0, %v360_v19, 0.0  ;;  %v387_v13 = vsel %vm325_vm0, %v386_v20, 0.0  ;;  %v413_v14 = vsel %vm325_vm0, %v412_v21, 0.0  ;;  %v439_v16 = vsel %vm325_vm0, %v438_v22, 0.0  ;;  %v461_v20 = vld [vmem:[#allocation2] sm:$0xf] }
  0x95   : > { %v371_v31 = vadd.f32 %v370_v27, %v369_v23  ;;  %v397_v32 = vadd.f32 %v396_v28, %v395_v24  ;;  %v423_v33 = vadd.f32 %v422_v29, %v421_v25  ;;  %v449_v34 = vadd.f32 %v448_v30, %v447_v26 }
  0x96   : > { %v362_v35 = vrot.slane %v361_v12, 4  ;;  %v388_v36 = vrot.slane %v387_v13, 4  ;;  %v414_v37 = vrot.slane %v413_v14, 4  ;;  %v440_v38 = vrot.slane %v439_v16, 4 }
  0x97   : > { %v372_v39 = vrot.slane %v371_v31, 2  ;;  %v398_v40 = vrot.slane %v397_v32, 2  ;;  %v424_v41 = vrot.slane %v423_v33, 2  ;;  %v450_v42 = vrot.slane %v449_v34, 2 }
  0x98   : > { %v363_v43 = vadd.f32 %v362_v35, %v361_v12  ;;  %v389_v44 = vadd.f32 %v388_v36, %v387_v13  ;;  %v415_v45 = vadd.f32 %v414_v37, %v413_v14  ;;  %v441_v46 = vadd.f32 %v440_v38, %v439_v16 }
  0x99   : > { %v373_v47 = vadd.f32 %v372_v39, %v371_v31  ;;  %v399_v48 = vadd.f32 %v398_v40, %v397_v32  ;;  %v425_v49 = vadd.f32 %v424_v41, %v423_v33  ;;  %v451_v50 = vadd.f32 %v450_v42, %v449_v34 }
  0x9a   : > { %v364_v51 = vrot.slane %v363_v43, 2  ;;  %v390_v52 = vrot.slane %v389_v44, 2  ;;  %v416_v53 = vrot.slane %v415_v45, 2  ;;  %v442_v54 = vrot.slane %v441_v46, 2 }
  0x9b   : > { %v374_v55 = vrot.slane %v373_v47, 1  ;;  %v400_v56 = vrot.slane %v399_v48, 1  ;;  %v426_v57 = vrot.slane %v425_v49, 1  ;;  %v452_v58 = vrot.slane %v451_v50, 1 }
  0x9c   : > { %v365_v59 = vadd.f32 %v364_v51, %v363_v43  ;;  %v391_v60 = vadd.f32 %v390_v52, %v389_v44  ;;  %v417_v61 = vadd.f32 %v416_v53, %v415_v45  ;;  %v443_v62 = vadd.f32 %v442_v54, %v441_v46 }
  0x9d   : > { %v375_v63 = vadd.f32 %v374_v55, %v373_v47  ;;  %v401_v0 = vadd.f32 %v400_v56, %v399_v48  ;;  %v427_v1 = vadd.f32 %v426_v57, %v425_v49  ;;  %v453_v2 = vadd.f32 %v452_v58, %v451_v50 }
  0x9e   : > { %v366_v3 = vrot.slane %v365_v59, 1  ;;  %v392_v4 = vrot.slane %v391_v60, 1  ;;  %v418_v5 = vrot.slane %v417_v61, 1  ;;  %v444_v6 = vrot.slane %v443_v62, 1 }
  0x9f   : > { %v470_v8 = vsel %vm462_vm5, %v375_v63, %v401_v0 }
  0xa0   : > { %v471_v9 = vsel %vm325_vm0, %v470_v8, %v427_v1  ;;  %v367_v10 = vadd.f32 %v366_v3, %v365_v59  ;;  %v393_v11 = vadd.f32 %v392_v4, %v391_v60  ;;  %v419_v15 = vadd.f32 %v418_v5, %v417_v61 }
  0xa1   : > { %v472_v17 = vsel %vm465_vm6, %v471_v9, %v453_v2  ;;  %v445_v18 = vadd.f32 %v444_v6, %v443_v62 }
  0xa2   : > { %v473_v19 = vadd.f32 %v472_v17, %v469_v7  ;;  %v463_v21 = vsel %vm462_vm5, %v367_v10, %v393_v11 }
  0xa3   : > { %v464_v22 = vsel %vm325_vm0, %v463_v21, %v419_v15 }
  0xa4   : > { %474 = vst [vmem:[#allocation3] sm:$0xf] %v473_v19  ;;  %v466_v23 = vsel %vm465_vm6, %v464_v22, %v445_v18 }
  0xa5   : > { %v467_v24 = vadd.f32 %v466_v23, %v461_v20 }
  0xa7   : > { %468 = vst [vmem:[#allocation2] sm:$0xf] %v467_v24 }
  0xab   : > { %v486_v25 = vld [vmem:[#allocation3] sm:$0xf] }
  0xac   : > { %487 = vst [vmem:[%s300_s10] sm:$0xf] %v486_v25 }
  0xad   : > { %907 = shalt.err (!%p904_p9)
}
  0xae   : > { %s908_s10 = scalar_lea.hbm %s1309_s25, 64  ;;  %s912_s0 = scalar_lea.hbm %s1421_s3, 128 }
  0xaf   : > { %p909_p1 = scmp.ne.s32.totalorder %s1309_s25, %s908_s10  ;;  %p913_p5 = scmp.lt.u32.totalorder %s1309_s25, %s1421_s3 }
  0xb0   : > { %p914_p13 = scmp.lt.u32.totalorder %s912_s0, %s908_s10  ;;  %p916_p8 = scmp.lt.u32.totalorder %s908_s10, %s1309_s25 }
  0xb1   : > { %p910_p6 = pnand %p909_p1, %p1442_p0 }
  0xb2   : > { %p915_p3 = por %p914_p13, %p913_p5 }
  0xb3   : > { %p911_p2 = pneg %p910_p6 }
  0xb4   : > { %p917_p11 = por %p916_p8, %p915_p3 }
  0xb6   : > { %p918_p4 = pnand %p917_p11, %p911_p2 }
  0xb8   : > { %921 = shalt.err (!%p918_p4)
}
  0xb9   : > { %749 = dma.vmem_to_hbm [thread:$0]  (%p1442_p0), %s1302_s8, 64, %s1309_s25, %s1323_s11   ;;  %v484_v26 = vld [vmem:[#allocation2] sm:$0xf] }
  0xba   : > { %s922_s23 = scalar_lea.vmem %s1311_s26, 64  ;;  %s1048_s13 = smov [#allocation13]  }
  0xbb   : > { %p923_p7 = scmp.ne.s32.totalorder %s1311_s26, %s922_s23  ;;  %s926_s9 = sshll.u32 %s1048_s13, 4  ;;  %s927_s9 = int_to_ptr.vmem [resolvable:$false] %s926_s9 }
  0xbc   : > { %s928_s14 = scalar_lea.vmem %s927_s9, 128  ;;  %p929_p9 = scmp.lt.s32.totalorder %s1311_s26, %s927_s9 }
  0xbd   : > { %p924_p10 = pnand %p923_p7, %p1442_p0  ;;  %p930_p1 = scmp.lt.s32.totalorder %s928_s14, %s922_s23 }
  0xbf   : > { %p925_p12 = pneg %p924_p10  ;;  %p931_p6 = por %p930_p1, %p929_p9 }
  0xc1   : > { %p932_p2 = pnand %p931_p6, %p925_p12 }
  0xc3   : > { %935 = shalt.err (!%p932_p2)
}
  0xc4   : > { %s936_s8 = scalar_lea.hbm %s1316_s18, 64  ;;  %s940_s10 = scalar_lea.hbm %s1422_s4, 128 }
  0xc5   : > { %p937_p5 = scmp.ne.s32.totalorder %s1316_s18, %s936_s8  ;;  %p941_p8 = scmp.lt.u32.totalorder %s1316_s18, %s1422_s4 }
  0xc6   : > { %p942_p11 = scmp.lt.u32.totalorder %s940_s10, %s936_s8  ;;  %p944_p7 = scmp.lt.u32.totalorder %s936_s8, %s1316_s18 }
  0xc7   : > { %p938_p13 = pnand %p937_p5, %p1442_p0 }
  0xc8   : > { %p943_p4 = por %p942_p11, %p941_p8 }
  0xc9   : > { %p939_p3 = pneg %p938_p13 }
  0xca   : > { %p945_p10 = por %p944_p7, %p943_p4 }
  0xcc   : > { %p946_p12 = pnand %p945_p10, %p939_p3 }
  0xce   : > { %949 = shalt.err (!%p946_p12)
}
  0xcf   : > { %750 = dma.vmem_to_hbm [thread:$0]  (%p1442_p0), %s1311_s26, 64, %s1316_s18, %s1323_s11  }
  0xd0   : > { %s1443_s0 = scalar_lea.vmem [#allocation10], %s1271_s27  ;;  %s491_s21 = scalar_lea.sflag [#allocation7], %s1229_s12 }
  0xd1   : > { %485 = vst [vmem:[%s1443_s0] sm:$0xf] %v484_v26  ;;  %s950_s1 = scalar_lea.vmem %s1304_s22, 64  ;;  %s1049_s23 = smov [#allocation10]  }
  0xd2   : > { %p951_p9 = scmp.ne.s32.totalorder %s1304_s22, %s950_s1  ;;  %s954_s13 = sshll.u32 %s1049_s23, 4  ;;  %s955_s13 = int_to_ptr.vmem [resolvable:$false] %s954_s13 }
  0xd3   : > { %s956_s9 = scalar_lea.vmem %s955_s13, 128  ;;  %p957_p2 = scmp.lt.s32.totalorder %s1304_s22, %s955_s13 }
  0xd4   : > { %p952_p1 = pnand %p951_p9, %p1442_p0  ;;  %p958_p5 = scmp.lt.s32.totalorder %s956_s9, %s950_s1 }
  0xd6   : > { %p953_p6 = pneg %p952_p1  ;;  %p959_p13 = por %p958_p5, %p957_p2 }
  0xd8   : > { %p960_p3 = pnand %p959_p13, %p953_p6 }
  0xda   : > { %963 = shalt.err (!%p960_p3)
}
  0xdb   : > { %s964_s12 = scalar_lea.hbm %s1321_s6, 64  ;;  %s968_s26 = scalar_lea.hbm %s1420_s2, 128 }
  0xdc   : > { %p965_p8 = scmp.ne.s32.totalorder %s1321_s6, %s964_s12  ;;  %p969_p7 = scmp.lt.u32.totalorder %s1321_s6, %s1420_s2 }
  0xdd   : > { %p970_p10 = scmp.lt.u32.totalorder %s968_s26, %s964_s12  ;;  %p972_p9 = scmp.lt.u32.totalorder %s964_s12, %s1321_s6 }
  0xde   : > { %p966_p11 = pnand %p965_p8, %p1442_p0 }
  0xdf   : > { %p971_p12 = por %p970_p10, %p969_p7 }
  0xe0   : > { %p967_p4 = pneg %p966_p11 }
  0xe1   : > { %p973_p1 = por %p972_p9, %p971_p12 }
  0xe3   : > { %p974_p6 = pnand %p973_p1, %p967_p4 }
  0xe5   : > { %977 = shalt.err (!%p974_p6)
}
  0xe6   : > { %748 = dma.vmem_to_hbm [thread:$0]  (%p1442_p0), %s1304_s22, 64, %s1321_s6, %s491_s21  }
  0xe7 PF: > { %s555_s8 = sand.u32 1, %s1020_s15   ;;  %p1444_p2 = scmp.ne.s32.totalorder %s1434_s30, 0 }
  0xe8   : > { %p1445_p5 = scmp.ge.s32.totalorder %s1040_s20, 2  ;;  %s556_s25 = scalar_lea.sflag [#allocation7], %s555_s8 }
  0xea   : > { %p762_p13 = pnand %p1445_p5, %p1444_p2 }
  0xec   : > { %1011 = dma.done.wait (!%p762_p13), %s556_s25, 64  }
  0xed   : > { %1013 = vsyncadd (!%p762_p13), %s556_s25, 4294967232  ;;  %s1446_s24 = sadd.s32 4294967294, %s1040_s20  }
  0xee   : > { %s564_s10 = sand.u32 1, %s1446_s24  }
  0xef   : > { %s565_s5 = scalar_lea.sflag [#allocation12], %s564_s10 }
  0xf0   : > { %1015 = dma.done.wait (!%p762_p13), %s565_s5, 128  }
  0xf1   : > { %1017 = vsyncadd (!%p762_p13), %s565_s5, 4294967168  ;;  %s27_s20 = sadd.s32 1, %s1040_s20   ;;  %s1447_s28 = sld [smem:[#allocation18_spill]] }
  0xf2   : > { %p24_p0 = scmp.ge.s32.totalorder %s27_s20, 4   ;;  %s1448_s15 = smov %s1024_s16 }
  0xf3   : > { %s1449_s16 = smov %s1028_s17  ;;  %s1450_s17 = smov %s1137_s29 }
  0xf4   : > { %s1451_s18 = smov %s1036_s19  ;;  %26 = sbr.rel (!%p24_p0) target bundleno = 13 (0xd), region = 126 }
  0xf7   : > { %s1452_s19 = smov %s1447_s28 }
  0xfb   :  { %579 = vsyncpa [#allocation6], 1 }
  0xfc   :  { %581 = vsyncpa [#allocation6 + $0x1], 1 }
  0xfd   :  { %582 = vsyncpa [#allocation9], 1 }
  0xfe   :  { %584 = vsyncpa [#allocation9 + $0x1], 1 }
  0xff   :  { %585 = vsyncpa [#allocation7], 1 }
 0x100   :  { %587 = vsyncpa [#allocation7 + $0x1], 1 }
 0x101   :  { %588 = vsyncpa [#allocation12], 1 }
 0x102   :  { %590 = vsyncpa [#allocation12 + $0x1], 1 }

</bundles_post_ra>
